<compile_context>
chip_gen: v7x
topology: tpu7x:2x2x1
jax: 0.10.0
libtpu: 0.0.40
codegen_flags: <defaults>
</compile_context>

<pallas_src>
import functools

import jax
import jax.numpy as jnp
import numpy as np
from jax.experimental import pallas as pl
from jax.experimental.pallas import tpu as pltpu


def _round_up(x, m):
    return (x + m - 1) // m * m


def temporal_block_kernel(x_ref, w1_ref, w2_ref, wd_ref, b_ref,
                          o_ref, win_ref, h1_ref, *,
                          dilation, pad, ksize, ph, hist, tl):
    """One (batch, time-tile) grid step.

    x_ref:   (TL, Cin_p)        current time tile, bf16, lane-padded
    w1_ref:  (K*Cin_p, Cout_p)  conv1 taps stacked along rows (tap-major)
    w2_ref:  (K*Cout_p, Cout_p) conv2 taps
    wd_ref:  (Cin_p, Cout_p)    1x1 downsample
    b_ref:   (3, Cout_p)        f32 biases: rows = [b1, b2, bd]
    o_ref:   (TL, Cout_p)       bf16 output tile
    win_ref: (HIST+TL, Cin_p)   bf16 scratch; rows [0,HIST) = causal x history
                                carried across time tiles, [HIST,HIST+TL) = x tile
    h1_ref:  (TL+PH, Cout_p)    bf16 scratch; conv1 output incl. PH halo rows
    """
    t = pl.program_id(1)
    cin_p = win_ref.shape[1]
    cout_p = o_ref.shape[-1]

    # Causal zero history at the first time tile of each batch element.
    @pl.when(t == 0)
    def _():
        win_ref[pl.ds(0, hist), :] = jnp.zeros((hist, cin_p), win_ref.dtype)

    # Stage the current x tile behind the history (HIST is 8-row aligned).
    win_ref[pl.ds(hist, tl), :] = x_ref[...]

    # ---- conv1 (dilated, causal) over TL+PH rows (PH halo rows feed conv2) ----
    # K unrolled per-tap matmuls accumulating in f32 (no materialized im2col).
    rows1 = tl + ph
    acc1 = jnp.dot(win_ref[pl.ds(ph - pad, rows1), :],
                   w1_ref[pl.ds(0, cin_p), :],
                   preferred_element_type=jnp.float32)
    for j in range(1, ksize):
        acc1 += jnp.dot(win_ref[pl.ds(ph - pad + j * dilation, rows1), :],
                        w1_ref[pl.ds(j * cin_p, cin_p), :],
                        preferred_element_type=jnp.float32)
    h1 = jnp.maximum(acc1 + b_ref[0:1, :], 0.0)               # relu1 (dropout=id)
    h1_ref[...] = h1.astype(h1_ref.dtype)

    # conv2's causal zero padding of h1 on the first tile: halo rows whose
    # global time index is negative must be zero (not relu(b1)).
    @pl.when(t == 0)
    def _():
        h1_ref[pl.ds(0, ph), :] = jnp.zeros((ph, cout_p), h1_ref.dtype)

    # ---- conv2 (dilated, causal), same per-tap accumulation ----
    acc2 = jnp.dot(h1_ref[pl.ds(ph - pad, tl), :],
                   w2_ref[pl.ds(0, cout_p), :],
                   preferred_element_type=jnp.float32)
    for j in range(1, ksize):
        acc2 += jnp.dot(h1_ref[pl.ds(ph - pad + j * dilation, tl), :],
                        w2_ref[pl.ds(j * cout_p, cout_p), :],
                        preferred_element_type=jnp.float32)
    h2 = jnp.maximum(acc2 + b_ref[1:2, :], 0.0)               # relu2 (dropout=id)

    # ---- residual 1x1 downsample + final ReLU ----
    res = jnp.dot(win_ref[pl.ds(hist, tl), :], wd_ref[...],
                  preferred_element_type=jnp.float32) + b_ref[2:3, :]
    o_ref[...] = jnp.maximum(h2 + res, 0.0).astype(o_ref.dtype)

    # Carry the last HIST x rows forward to the next time tile of this batch.
    win_ref[pl.ds(0, hist), :] = win_ref[pl.ds(tl, hist), :]


def weight_norm_effective(v, g):
    """PyTorch weight_norm: w = g * v / ||v||, norm over all dims except dim 0."""
    norm = jnp.sqrt(jnp.sum(v * v, axis=(1, 2), keepdims=True))
    return g[:, None, None] * v / norm


def temporal_block_forward(x, params, *, kernel_size, dilation, time_tile=2048):
    """x: (B, C_in, L) float32 (PyTorch NCW). Returns (B, C_out, L)."""
    B, Cin, L = x.shape
    K = kernel_size
    pad = (K - 1) * dilation
    Cout = params["w1_v"].shape[0]

    # Alignment / tiling parameters.
    PH = _round_up(max(pad, 1), 8)        # h1 halo rows (sublane aligned)
    HIST = 2 * PH                          # x history rows carried across tiles
    TL = min(_round_up(L, 16), _round_up(time_tile, 16))
    TL = max(TL, HIST)                     # history must fit inside one tile
    L_pad = _round_up(L, TL)
    T = L_pad // TL
    Cin_p = _round_up(Cin, 128)            # lane-dense channels
    Cout_p = _round_up(Cout, 128)

    # Effective (weight-normed) weights, padded + reshaped to tap-major operands.
    w1_full = weight_norm_effective(params["w1_v"], params["w1_g"])  # (Cout,Cin,K)
    w2_full = weight_norm_effective(params["w2_v"], params["w2_g"])  # (Cout,Cout,K)

    def prep_conv_w(w, cin_p):
        co, ci, k = w.shape
        w = jnp.transpose(w, (2, 1, 0))                      # (K, Cin, Cout)
        w = jnp.pad(w, ((0, 0), (0, cin_p - ci), (0, Cout_p - co)))
        return w.reshape(k * cin_p, Cout_p).astype(jnp.bfloat16)

    w1 = prep_conv_w(w1_full, Cin_p)                          # (K*Cin_p, Cout_p)
    w2 = prep_conv_w(w2_full, Cout_p)                         # (K*Cout_p, Cout_p)
    wd = jnp.pad(jnp.transpose(params["wd"][:, :, 0], (1, 0)),
                 ((0, Cin_p - Cin), (0, Cout_p - Cout))).astype(jnp.bfloat16)

    def prep_b(b):
        return jnp.pad(b, (0, Cout_p - Cout)).reshape(1, Cout_p).astype(jnp.float32)

    b_all = jnp.concatenate(
        [prep_b(params["b1"]), prep_b(params["b2"]), prep_b(params["bd"])], axis=0)

    # NCW -> NWC, bf16, pad channels to lane width, pad time to a tile multiple.
    # (No left padding in HBM: causal zeros come from the in-kernel history carry.)
    # TODO(synk): for stacked TemporalBlocks keep activations in NWC/bf16 across
    # blocks so this transpose/pad is paid once per network, not per block.
    x_nwc = jnp.transpose(x, (0, 2, 1)).astype(jnp.bfloat16)
    x_nwc = jnp.pad(x_nwc, ((0, 0), (0, L_pad - L), (0, Cin_p - Cin)))

    kern = functools.partial(temporal_block_kernel, dilation=dilation, pad=pad,
                             ksize=K, ph=PH, hist=HIST, tl=TL)

    out_nwc = pl.pallas_call(
        kern,
        out_shape=jax.ShapeDtypeStruct((B, L_pad, Cout_p), jnp.bfloat16),
        grid=(B, T),
        in_specs=[
            pl.BlockSpec((None, TL, Cin_p), lambda b, t: (b, t, 0)),       # x tile
            pl.BlockSpec((K * Cin_p, Cout_p), lambda b, t: (0, 0)),        # w1
            pl.BlockSpec((K * Cout_p, Cout_p), lambda b, t: (0, 0)),       # w2
            pl.BlockSpec((Cin_p, Cout_p), lambda b, t: (0, 0)),            # wd
            pl.BlockSpec((3, Cout_p), lambda b, t: (0, 0)),                # biases
        ],
        out_specs=pl.BlockSpec((None, TL, Cout_p), lambda b, t: (b, t, 0)),
        scratch_shapes=[
            pltpu.VMEM((HIST + TL, Cin_p), jnp.bfloat16),   # x window + history
            pltpu.VMEM((TL + PH, Cout_p), jnp.bfloat16),    # h1 with causal halo
        ],
        compiler_params=pltpu.CompilerParams(
            dimension_semantics=("parallel", "arbitrary"),
            vmem_limit_bytes=48 * 1024 * 1024),
    )(x_nwc, w1, w2, wd, b_all)

    # Drop time/channel padding, back to NCW.
    return jnp.transpose(out_nwc[:, :L, :Cout], (0, 2, 1)).astype(x.dtype)


def reference_forward(x, params, *, kernel_size, dilation):
    """Pure-JAX reference (NCW).  Operands are rounded to bf16 exactly like the
    kernel's MXU path (accumulation stays f32), so the comparison is tight."""
    pad = (kernel_size - 1) * dilation
    L = x.shape[2]
    dn = ("NCH", "OIH", "NCH")
    rnd = lambda a: a.astype(jnp.bfloat16).astype(jnp.float32)

    def conv(inp, w, b, dil, p):
        y = jax.lax.conv_general_dilated(
            inp, w, window_strides=(1,), padding=[(p, p)],
            rhs_dilation=(dil,), dimension_numbers=dn,
            precision=jax.lax.Precision.HIGHEST)
        return y + b[None, :, None]

    w1 = rnd(weight_norm_effective(params["w1_v"], params["w1_g"]))
    w2 = rnd(weight_norm_effective(params["w2_v"], params["w2_g"]))
    xr = rnd(x)

    h = conv(xr, w1, params["b1"], dilation, pad)[:, :, :L]   # conv1 + chomp
    h = jnp.maximum(h, 0.0)                                   # relu1 (dropout=id)
    h = rnd(h)                                                # kernel feeds bf16 h1
    h = conv(h, w2, params["b2"], dilation, pad)[:, :, :L]    # conv2 + chomp
    h = jnp.maximum(h, 0.0)                                   # relu2 (dropout=id)
    res = conv(xr, rnd(params["wd"]), params["bd"], 1, 0)     # 1x1 downsample
    return jnp.maximum(h + res, 0.0)


def make_params(key, n_inputs, n_outputs, kernel_size):
    ks = jax.random.split(key, 8)
    return {
        "w1_v": 0.01 * jax.random.normal(ks[0], (n_outputs, n_inputs, kernel_size), jnp.float32),
        "w1_g": 0.5 + jax.random.uniform(ks[1], (n_outputs,), jnp.float32),
        "b1":   0.1 * jax.random.normal(ks[2], (n_outputs,), jnp.float32),
        "w2_v": 0.01 * jax.random.normal(ks[3], (n_outputs, n_outputs, kernel_size), jnp.float32),
        "w2_g": 0.5 + jax.random.uniform(ks[4], (n_outputs,), jnp.float32),
        "b2":   0.1 * jax.random.normal(ks[5], (n_outputs,), jnp.float32),
        "wd":   0.01 * jax.random.normal(ks[6], (n_outputs, n_inputs, 1), jnp.float32),
        "bd":   0.1 * jax.random.normal(ks[7], (n_outputs,), jnp.float32),
    }


if __name__ == "__main__":
    B, C_IN, C_OUT, L = 2, 8, 16, 16
    KSIZE, STRIDE, DILATION = 3, 1, 2
    PADDING = (KSIZE - 1) * DILATION  # standard TCN causal padding

    key = jax.random.PRNGKey(0)
    kx, kp = jax.random.split(key)
    x = jax.random.normal(kx, (B, C_IN, L), jnp.float32)
    params = make_params(kp, C_IN, C_OUT, KSIZE)

    out = temporal_block_forward(x, params, kernel_size=KSIZE, dilation=DILATION)
    out = jax.block_until_ready(out)

    ref = reference_forward(x, params, kernel_size=KSIZE, dilation=DILATION)
    # Kernel output is bf16 (per perf review); loosen tolerance for the final round.
    np.testing.assert_allclose(np.asarray(out), np.asarray(ref), rtol=1e-2, atol=2e-3)

    print("KERNEL_OK")
</pallas_src>

<mosaic_0001>
module attributes {stable_mosaic.version = 11 : i64} {
  func.func @temporal_block_kernel(%arg0: i32, %arg1: i32, %arg2: memref<1x16x128xbf16, #tpu.memory_space<vmem>>, %arg3: memref<384x128xbf16, #tpu.memory_space<vmem>>, %arg4: memref<384x128xbf16, #tpu.memory_space<vmem>>, %arg5: memref<128x128xbf16, #tpu.memory_space<vmem>>, %arg6: memref<3x128xf32, #tpu.memory_space<vmem>>, %arg7: memref<1x16x128xbf16, #tpu.memory_space<vmem>>, %arg8: memref<32x128xbf16, #tpu.memory_space<vmem>>, %arg9: memref<24x128xbf16, #tpu.memory_space<vmem>>) attributes {dimension_semantics = [#tpu.dimension_semantics<parallel>, #tpu.dimension_semantics<arbitrary>], iteration_bounds = array<i64: 2, 1>, scalar_prefetch = 0 : i64, scratch_operands = 2 : i64, tpu.core_type = #tpu.core_type<tc>, window_params = [{transform_indices = @transform_0, window_bounds = array<i64: 1, 16, 128>}, {pipeline_mode = #tpu.pipeline_mode<synchronous>, transform_indices = @transform_1, window_bounds = array<i64: 384, 128>}, {pipeline_mode = #tpu.pipeline_mode<synchronous>, transform_indices = @transform_2, window_bounds = array<i64: 384, 128>}, {pipeline_mode = #tpu.pipeline_mode<synchronous>, transform_indices = @transform_3, window_bounds = array<i64: 128, 128>}, {pipeline_mode = #tpu.pipeline_mode<synchronous>, transform_indices = @transform_4, window_bounds = array<i64: 3, 128>}, {transform_indices = @transform_5, window_bounds = array<i64: 1, 16, 128>}]} {
    %c0_i32 = arith.constant 0 : i32
    %0 = arith.cmpi eq, %arg1, %c0_i32 : i32
    %1 = arith.extui %0 : i1 to i32
    %c0_i32_0 = arith.constant 0 : i32
    %2 = arith.cmpi ne, %1, %c0_i32_0 : i32
    scf.if %2 {
      %cst_51 = arith.constant 0.000000e+00 : bf16
      %58 = vector.broadcast %cst_51 : bf16 to vector<16x128xbf16>
      %c0_52 = arith.constant 0 : index
      %c0_53 = arith.constant 0 : index
      %59 = vector.load %arg8[%c0_52, %c0_53] : memref<32x128xbf16, #tpu.memory_space<vmem>>, vector<16x128xbf16>
      tpu.vector_store %arg8[%c0_52, %c0_53], %58 {strides = array<i32>} : memref<32x128xbf16, #tpu.memory_space<vmem>>, vector<16x128xbf16>,
    } else {
    }
    %c0 = arith.constant 0 : index
    %c0_1 = arith.constant 0 : index
    %c0_2 = arith.constant 0 : index
    %3 = vector.load %arg2[%c0, %c0_1, %c0_2] : memref<1x16x128xbf16, #tpu.memory_space<vmem>>, vector<1x16x128xbf16>
    %4 = vector.shape_cast %3 : vector<1x16x128xbf16> to vector<16x128xbf16>
    %c16 = arith.constant 16 : index
    %c0_3 = arith.constant 0 : index
    %5 = vector.load %arg8[%c16, %c0_3] : memref<32x128xbf16, #tpu.memory_space<vmem>>, vector<16x128xbf16>
    tpu.vector_store %arg8[%c16, %c0_3], %4 {strides = array<i32>} : memref<32x128xbf16, #tpu.memory_space<vmem>>, vector<16x128xbf16>,
    %c4 = arith.constant 4 : index
    %c0_4 = arith.constant 0 : index
    %6 = vector.load %arg8[%c4, %c0_4] : memref<32x128xbf16, #tpu.memory_space<vmem>>, vector<24x128xbf16>
    %c0_5 = arith.constant 0 : index
    %c0_6 = arith.constant 0 : index
    %7 = vector.load %arg3[%c0_5, %c0_6] : memref<384x128xbf16, #tpu.memory_space<vmem>>, vector<128x128xbf16>
    %cst = arith.constant dense<0.000000e+00> : vector<24x128xf32>
    %8 = tpu.matmul %6, %7, %cst {dimension_numbers = #tpu.dot_dimension_numbers<[1], [0], [0], [1], [0, 0, 1, 1], [], []>} : vector<24x128xbf16>, vector<128x128xbf16>, vector<24x128xf32> -> vector<24x128xf32>
    %c6 = arith.constant 6 : index
    %c0_7 = arith.constant 0 : index
    %9 = vector.load %arg8[%c6, %c0_7] : memref<32x128xbf16, #tpu.memory_space<vmem>>, vector<24x128xbf16>
    %c128 = arith.constant 128 : index
    %c0_8 = arith.constant 0 : index
    %10 = vector.load %arg3[%c128, %c0_8] : memref<384x128xbf16, #tpu.memory_space<vmem>>, vector<128x128xbf16>
    %cst_9 = arith.constant dense<0.000000e+00> : vector<24x128xf32>
    %11 = tpu.matmul %9, %10, %cst_9 {dimension_numbers = #tpu.dot_dimension_numbers<[1], [0], [0], [1], [0, 0, 1, 1], [], []>} : vector<24x128xbf16>, vector<128x128xbf16>, vector<24x128xf32> -> vector<24x128xf32>
    %12 = arith.addf %8, %11 : vector<24x128xf32>
    %c8 = arith.constant 8 : index
    %c0_10 = arith.constant 0 : index
    %13 = vector.load %arg8[%c8, %c0_10] : memref<32x128xbf16, #tpu.memory_space<vmem>>, vector<24x128xbf16>
    %c256 = arith.constant 256 : index
    %c0_11 = arith.constant 0 : index
    %14 = vector.load %arg3[%c256, %c0_11] : memref<384x128xbf16, #tpu.memory_space<vmem>>, vector<128x128xbf16>
    %cst_12 = arith.constant dense<0.000000e+00> : vector<24x128xf32>
    %15 = tpu.matmul %13, %14, %cst_12 {dimension_numbers = #tpu.dot_dimension_numbers<[1], [0], [0], [1], [0, 0, 1, 1], [], []>} : vector<24x128xbf16>, vector<128x128xbf16>, vector<24x128xf32> -> vector<24x128xf32>
    %16 = arith.addf %12, %15 : vector<24x128xf32>
    %c0_13 = arith.constant 0 : index
    %c0_14 = arith.constant 0 : index
    %17 = vector.load %arg6[%c0_13, %c0_14] : memref<3x128xf32, #tpu.memory_space<vmem>>, vector<1x128xf32>
    %18 = vector.broadcast %17 : vector<1x128xf32> to vector<24x128xf32>
    %19 = arith.addf %16, %18 : vector<24x128xf32>
    %cst_15 = arith.constant 0.000000e+00 : f32
    %20 = vector.broadcast %cst_15 : f32 to vector<24x128xf32>
    %21 = arith.maximumf %19, %20 : vector<24x128xf32>
    %22 = arith.truncf %21 : vector<24x128xf32> to vector<24x128xbf16>
    %c0_16 = arith.constant 0 : index
    %c0_17 = arith.constant 0 : index
    %23 = vector.load %arg9[%c0_16, %c0_17] : memref<24x128xbf16, #tpu.memory_space<vmem>>, vector<24x128xbf16>
    tpu.vector_store %arg9[%c0_16, %c0_17], %22 {strides = array<i32>} : memref<24x128xbf16, #tpu.memory_space<vmem>>, vector<24x128xbf16>,
    %c0_i32_18 = arith.constant 0 : i32
    %24 = arith.cmpi eq, %arg1, %c0_i32_18 : i32
    %25 = arith.extui %24 : i1 to i32
    %c0_i32_19 = arith.constant 0 : i32
    %26 = arith.cmpi ne, %25, %c0_i32_19 : i32
    scf.if %26 {
      %cst_51 = arith.constant 0.000000e+00 : bf16
      %58 = vector.broadcast %cst_51 : bf16 to vector<8x128xbf16>
      %c0_52 = arith.constant 0 : index
      %c0_53 = arith.constant 0 : index
      %59 = vector.load %arg9[%c0_52, %c0_53] : memref<24x128xbf16, #tpu.memory_space<vmem>>, vector<8x128xbf16>
      tpu.vector_store %arg9[%c0_52, %c0_53], %58 {strides = array<i32>} : memref<24x128xbf16, #tpu.memory_space<vmem>>, vector<8x128xbf16>,
    } else {
    }
    %c4_20 = arith.constant 4 : index
    %c0_21 = arith.constant 0 : index
    %27 = vector.load %arg9[%c4_20, %c0_21] : memref<24x128xbf16, #tpu.memory_space<vmem>>, vector<16x128xbf16>
    %c0_22 = arith.constant 0 : index
    %c0_23 = arith.constant 0 : index
    %28 = vector.load %arg4[%c0_22, %c0_23] : memref<384x128xbf16, #tpu.memory_space<vmem>>, vector<128x128xbf16>
    %cst_24 = arith.constant dense<0.000000e+00> : vector<16x128xf32>
    %29 = tpu.matmul %27, %28, %cst_24 {dimension_numbers = #tpu.dot_dimension_numbers<[1], [0], [0], [1], [0, 0, 1, 1], [], []>} : vector<16x128xbf16>, vector<128x128xbf16>, vector<16x128xf32> -> vector<16x128xf32>
    %c6_25 = arith.constant 6 : index
    %c0_26 = arith.constant 0 : index
    %30 = vector.load %arg9[%c6_25, %c0_26] : memref<24x128xbf16, #tpu.memory_space<vmem>>, vector<16x128xbf16>
    %c128_27 = arith.constant 128 : index
    %c0_28 = arith.constant 0 : index
    %31 = vector.load %arg4[%c128_27, %c0_28] : memref<384x128xbf16, #tpu.memory_space<vmem>>, vector<128x128xbf16>
    %cst_29 = arith.constant dense<0.000000e+00> : vector<16x128xf32>
    %32 = tpu.matmul %30, %31, %cst_29 {dimension_numbers = #tpu.dot_dimension_numbers<[1], [0], [0], [1], [0, 0, 1, 1], [], []>} : vector<16x128xbf16>, vector<128x128xbf16>, vector<16x128xf32> -> vector<16x128xf32>
    %33 = arith.addf %29, %32 : vector<16x128xf32>
    %c8_30 = arith.constant 8 : index
    %c0_31 = arith.constant 0 : index
    %34 = vector.load %arg9[%c8_30, %c0_31] : memref<24x128xbf16, #tpu.memory_space<vmem>>, vector<16x128xbf16>
    %c256_32 = arith.constant 256 : index
    %c0_33 = arith.constant 0 : index
    %35 = vector.load %arg4[%c256_32, %c0_33] : memref<384x128xbf16, #tpu.memory_space<vmem>>, vector<128x128xbf16>
    %cst_34 = arith.constant dense<0.000000e+00> : vector<16x128xf32>
    %36 = tpu.matmul %34, %35, %cst_34 {dimension_numbers = #tpu.dot_dimension_numbers<[1], [0], [0], [1], [0, 0, 1, 1], [], []>} : vector<16x128xbf16>, vector<128x128xbf16>, vector<16x128xf32> -> vector<16x128xf32>
    %37 = arith.addf %33, %36 : vector<16x128xf32>
    %c1 = arith.constant 1 : index
    %c0_35 = arith.constant 0 : index
    %38 = vector.load %arg6[%c1, %c0_35] : memref<3x128xf32, #tpu.memory_space<vmem>>, vector<1x128xf32>
    %39 = vector.broadcast %38 : vector<1x128xf32> to vector<16x128xf32>
    %40 = arith.addf %37, %39 : vector<16x128xf32>
    %cst_36 = arith.constant 0.000000e+00 : f32
    %41 = vector.broadcast %cst_36 : f32 to vector<16x128xf32>
    %42 = arith.maximumf %40, %41 : vector<16x128xf32>
    %c16_37 = arith.constant 16 : index
    %c0_38 = arith.constant 0 : index
    %43 = vector.load %arg8[%c16_37, %c0_38] : memref<32x128xbf16, #tpu.memory_space<vmem>>, vector<16x128xbf16>
    %c0_39 = arith.constant 0 : index
    %c0_40 = arith.constant 0 : index
    %44 = vector.load %arg5[%c0_39, %c0_40] : memref<128x128xbf16, #tpu.memory_space<vmem>>, vector<128x128xbf16>
    %cst_41 = arith.constant dense<0.000000e+00> : vector<16x128xf32>
    %45 = tpu.matmul %43, %44, %cst_41 {dimension_numbers = #tpu.dot_dimension_numbers<[1], [0], [0], [1], [0, 0, 1, 1], [], []>} : vector<16x128xbf16>, vector<128x128xbf16>, vector<16x128xf32> -> vector<16x128xf32>
    %c2 = arith.constant 2 : index
    %c0_42 = arith.constant 0 : index
    %46 = vector.load %arg6[%c2, %c0_42] : memref<3x128xf32, #tpu.memory_space<vmem>>, vector<1x128xf32>
    %47 = vector.broadcast %46 : vector<1x128xf32> to vector<16x128xf32>
    %48 = arith.addf %45, %47 : vector<16x128xf32>
    %49 = arith.addf %42, %48 : vector<16x128xf32>
    %cst_43 = arith.constant 0.000000e+00 : f32
    %50 = vector.broadcast %cst_43 : f32 to vector<16x128xf32>
    %51 = arith.maximumf %49, %50 : vector<16x128xf32>
    %52 = arith.truncf %51 : vector<16x128xf32> to vector<16x128xbf16>
    %c0_44 = arith.constant 0 : index
    %c0_45 = arith.constant 0 : index
    %c0_46 = arith.constant 0 : index
    %53 = vector.load %arg7[%c0_44, %c0_45, %c0_46] : memref<1x16x128xbf16, #tpu.memory_space<vmem>>, vector<1x16x128xbf16>
    %54 = vector.shape_cast %53 : vector<1x16x128xbf16> to vector<16x128xbf16>
    %55 = vector.shape_cast %52 : vector<16x128xbf16> to vector<1x16x128xbf16>
    tpu.vector_store %arg7[%c0_44, %c0_45, %c0_46], %55 {strides = array<i32>} : memref<1x16x128xbf16, #tpu.memory_space<vmem>>, vector<1x16x128xbf16>,
    %c16_47 = arith.constant 16 : index
    %c0_48 = arith.constant 0 : index
    %56 = vector.load %arg8[%c16_47, %c0_48] : memref<32x128xbf16, #tpu.memory_space<vmem>>, vector<16x128xbf16>
    %c0_49 = arith.constant 0 : index
    %c0_50 = arith.constant 0 : index
    %57 = vector.load %arg8[%c0_49, %c0_50] : memref<32x128xbf16, #tpu.memory_space<vmem>>, vector<16x128xbf16>
    tpu.vector_store %arg8[%c0_49, %c0_50], %56 {strides = array<i32>} : memref<32x128xbf16, #tpu.memory_space<vmem>>, vector<16x128xbf16>,
    return
  }
  func.func @transform_0(%arg0: i32, %arg1: i32) -> (i32, i32, i32) {
    %c0_i32 = arith.constant 0 : i32
    %c0_i32_0 = arith.constant 0 : i32
    return %arg0, %arg1, %c0_i32 : i32, i32, i32
  }
  func.func @transform_1(%arg0: i32, %arg1: i32) -> (i32, i32) {
    %c0_i32 = arith.constant 0 : i32
    %c0_i32_0 = arith.constant 0 : i32
    %c0_i32_1 = arith.constant 0 : i32
    return %c0_i32, %c0_i32_0 : i32, i32
  }
  func.func @transform_2(%arg0: i32, %arg1: i32) -> (i32, i32) {
    %c0_i32 = arith.constant 0 : i32
    %c0_i32_0 = arith.constant 0 : i32
    %c0_i32_1 = arith.constant 0 : i32
    return %c0_i32, %c0_i32_0 : i32, i32
  }
  func.func @transform_3(%arg0: i32, %arg1: i32) -> (i32, i32) {
    %c0_i32 = arith.constant 0 : i32
    %c0_i32_0 = arith.constant 0 : i32
    %c0_i32_1 = arith.constant 0 : i32
    return %c0_i32, %c0_i32_0 : i32, i32
  }
  func.func @transform_4(%arg0: i32, %arg1: i32) -> (i32, i32) {
    %c0_i32 = arith.constant 0 : i32
    %c0_i32_0 = arith.constant 0 : i32
    %c0_i32_1 = arith.constant 0 : i32
    return %c0_i32, %c0_i32_0 : i32, i32
  }
  func.func @transform_5(%arg0: i32, %arg1: i32) -> (i32, i32, i32) {
    %c0_i32 = arith.constant 0 : i32
    %c0_i32_0 = arith.constant 0 : i32
    return %arg0, %arg1, %c0_i32 : i32, i32, i32
  }
}

</mosaic_0001>

<bundles_post_ra>
// kernel: tpu_custom_call.1
= control target key start
LH: loop header
LB: loop body
LE: loop exit
PB: predicated region body
PF: predicated region fallthrough
CT: control target
= control target key end

     0   :  { %10 = vsyncpa [#allocation5], 0  ;;  %s2429_s0 = inlined_call_operand.hbm [shape: bf16[2,16,128], index: 0, kind: input, shape index: {}]   ;;  %s2430_s1 = inlined_call_operand.hbm [shape: bf16[384,128], index: 1, kind: input, shape index: {}]   ;;  %s2431_s2 = inlined_call_operand.hbm [shape: bf16[384,128], index: 2, kind: input, shape index: {}]   ;;  %s2432_s3 = inlined_call_operand.hbm [shape: bf16[128,128], index: 3, kind: input, shape index: {}]   ;;  %s2433_s4 = inlined_call_operand.vmem [shape: f32[3,128], index: 4, kind: input, shape index: {}]   ;;  %s2434_s5 = inlined_call_operand.hbm [shape: bf16[2,16,128], index: 5, kind: output, shape index: {}]  }
   0x1   :  { %12 = vsyncpa [#allocation5 + $0x1], 0 }
   0x2   :  { %13 = vsyncpa [#allocation8], 0 }
   0x3   :  { %14 = vsyncpa [#allocation11], 0 }
   0x4   :  { %15 = vsyncpa [#allocation6], 0 }
   0x5   :  { %17 = vsyncpa [#allocation6 + $0x1], 0  ;;  %s2063_s18 = smov 0   ;;  %s2065_s19 = smov 0  }
   0x6   :  { %s2067_s20 = smov 0   ;;  %s2069_s21 = smov 0  }
   0x7   :  { %s2071_s22 = smov 0   ;;  %s2073_s23 = smov 0  }
   0x8 LB: > { %2441 = sst [smem:[#allocation17_spill]] %s1999_s18  ;;  %s1339_s24 = sadd.s32 4294967295, %s2019_s23   ;;  %s2019_s23 = sphi %s2073_s23, %s23_s23   ;;  %s2015_s22 = sphi %s2071_s22, %s2464_s22   ;;  %s2011_s21 = sphi %s2069_s21, %s2463_s21   ;;  %s2007_s20 = sphi %s2067_s20, %s2462_s20   ;;  %s2003_s19 = sphi %s2065_s19, %s2461_s19   ;;  %s1999_s18 = sphi %s2063_s18, %s2460_s18  }
   0x9   : > { %s1340_s25 = sadd.s32 4294967294, %s2019_s23   ;;  %p57_p0 = scmp.ne.s32.totalorder %s2003_s19, %s1999_s18 }
   0xa   : > { %p2097_p1 = scmp.eq.s32.totalorder %s1339_s24, 0  ;;  %p2101_p2 = scmp.eq.s32.totalorder %s1339_s24, 1 }
   0xb   : > { %p173_p3 = scmp.eq.s32.totalorder %s1340_s25, 1  ;;  %p1341_p5 = scmp.ge.s32.totalorder %s2019_s23, 1 }
   0xc   : > { %s2442_s26 = scalar_select %p2097_p1, 1, 0 }
   0xd   : > { %s2443_s27 = scalar_select %p2101_p2, 1, 0 }
   0xe   : > { %p2107_p4 = por %p2097_p1, %p57_p0  ;;  %p2112_p6 = por %p173_p3, %p57_p0 }
   0xf   : > { %p180_p7 = scmp.lt.s32.totalorder %s2019_s23, 3  ;;  %s2021_s6 = smov [#allocation7]  }
  0x10   : > { %s2444_s28 = scalar_select %p2107_p4, 1, 0 }
  0x11   : > { %s2445_s29 = scalar_select %p2112_p6, 1, 0 }
  0x12   : > { %p2117_p8 = pnand %p1341_p5, %p180_p7  ;;  %s192_s7 = sshll.u32 %s2021_s6, 4  ;;  %s2121_s7 = int_to_ptr.vmem [resolvable:$true] %s192_s7 }
  0x13   : > { %2446 = sst [smem:[#allocation18_spill]] %s2445_s29  ;;  %s2022_s9 = smov [#allocation9]  }
  0x14   : > { %s2447_s30 = scalar_select %p2117_p8, 1, 0 }
  0x15   : > { %p1669_p9 = pneg %p2117_p8  ;;  %s205_s10 = sshll.u32 %s2022_s9, 4  ;;  %s2132_s10 = int_to_ptr.vmem [resolvable:$true] %s205_s10 }
  0x16   : > { %s2023_s11 = smov [#allocation10]   ;;  %s1815_s15 = scalar_lea.hbm %s2430_s1, 3072 }
  0x17   : > { %p2128_p11 = pnand %p1669_p9, %p2097_p1  ;;  %s2134_s12 = sshll.u32 %s2023_s11, 4  ;;  %s219_s12 = int_to_ptr.vmem [resolvable:$true] %s2134_s12 }
  0x18   : > { %p1816_p12 = scmp.ne.s32.totalorder %s2430_s1, %s1815_s15  ;;  %p1822_p5 = scmp.lt.u32.totalorder %s1815_s15, %s2430_s1 }
  0x19   : > { %p2144_p13 = pneg %p2128_p11 }
  0x1b   : > { %p1818_p0 = pnand %p2144_p13, %p1816_p12 }
  0x1d   : > { %p1819_p3 = pneg %p1818_p0 }
  0x1f   : > { %p1824_p7 = pnand %p1822_p5, %p1819_p3 }
  0x21   : > { %1827 = shalt.err (!%p1824_p7)
}
  0x22   : > { %s1828_s9 = scalar_lea.vmem %s2121_s7, 3072  ;;  %p1836_p1 = scmp.lt.s32.totalorder %s2121_s7, %s2121_s7 }
  0x23   : > { %p1829_p9 = scmp.ne.s32.totalorder %s2121_s7, %s1828_s9  ;;  %p1837_p4 = scmp.lt.s32.totalorder %s1828_s9, %s1828_s9 }
  0x25   : > { %p1831_p10 = pnand %p1829_p9, %p2144_p13  ;;  %p1838_p12 = por %p1837_p4, %p1836_p1 }
  0x27   : > { %p1832_p6 = pneg %p1831_p10 }
  0x29   : > { %p1839_p0 = pnand %p1838_p12, %p1832_p6 }
  0x2b   : > { %1842 = shalt.err (!%p1839_p0)
}
  0x2c   : > { %s2024_s11 = smov 64   ;;  %s2025_s13 = smov 4  }
  0x2d   : > { %1672 = dma.hbm_to_vmem [thread:$0]  (!%p2128_p11), %s2430_s1, 3072, %s2121_s7, [#allocation8], %s2024_s11, %s2024_s11, %s2025_s13  }
  0x2e   : > { %s1843_s25 = scalar_lea.hbm %s2431_s2, 3072 }
  0x2f   : > { %p1844_p1 = scmp.ne.s32.totalorder %s2431_s2, %s1843_s25  ;;  %p1850_p10 = scmp.lt.u32.totalorder %s1843_s25, %s2431_s2 }
  0x31   : > { %p1846_p4 = pnand %p1844_p1, %p2144_p13 }
  0x33   : > { %p1847_p6 = pneg %p1846_p4 }
  0x35   : > { %p1852_p3 = pnand %p1850_p10, %p1847_p6 }
  0x37   : > { %1855 = shalt.err (!%p1852_p3)
}
  0x38   : > { %s1856_s7 = scalar_lea.vmem %s2132_s10, 3072  ;;  %p1864_p12 = scmp.lt.s32.totalorder %s2132_s10, %s2132_s10 }
  0x39   : > { %p1857_p5 = scmp.ne.s32.totalorder %s2132_s10, %s1856_s7  ;;  %p1865_p0 = scmp.lt.s32.totalorder %s1856_s7, %s1856_s7 }
  0x3b   : > { %p1859_p7 = pnand %p1857_p5, %p2144_p13  ;;  %p1866_p1 = por %p1865_p0, %p1864_p12 }
  0x3d   : > { %p1860_p9 = pneg %p1859_p7 }
  0x3f   : > { %p1867_p4 = pnand %p1866_p1, %p1860_p9 }
  0x41   : > { %1870 = shalt.err (!%p1867_p4)
}
  0x42   : > { %1675 = dma.hbm_to_vmem [thread:$0]  (!%p2128_p11), %s2431_s2, 3072, %s2132_s10, [#allocation8], %s2024_s11, %s2024_s11, %s2025_s13  }
  0x43   : > { %s1871_s16 = scalar_lea.hbm %s2432_s3, 1024 }
  0x44   : > { %p1872_p6 = scmp.ne.s32.totalorder %s2432_s3, %s1871_s16  ;;  %p1878_p5 = scmp.lt.u32.totalorder %s1871_s16, %s2432_s3 }
  0x46   : > { %p1874_p10 = pnand %p1872_p6, %p2144_p13 }
  0x48   : > { %p1875_p3 = pneg %p1874_p10 }
  0x4a   : > { %p1880_p7 = pnand %p1878_p5, %p1875_p3 }
  0x4c   : > { %1883 = shalt.err (!%p1880_p7)
}
  0x4d   : > { %s1884_s7 = scalar_lea.vmem %s219_s12, 1024  ;;  %p1892_p1 = scmp.lt.s32.totalorder %s219_s12, %s219_s12 }
  0x4e   : > { %p1885_p9 = scmp.ne.s32.totalorder %s219_s12, %s1884_s7  ;;  %p1893_p4 = scmp.lt.s32.totalorder %s1884_s7, %s1884_s7 }
  0x50   : > { %p1887_p12 = pnand %p1885_p9, %p2144_p13  ;;  %p1894_p8 = por %p1893_p4, %p1892_p1 }
  0x52   : > { %p1888_p0 = pneg %p1887_p12 }
  0x54   : > { %p1895_p2 = pnand %p1894_p8, %p1888_p0 }
  0x56   : > { %1898 = shalt.err (!%p1895_p2)
}
  0x57   : > { %1678 = dma.hbm_to_vmem [thread:$0]  (!%p2128_p11), %s2432_s3, 1024, %s219_s12, [#allocation11], %s2024_s11, %s2024_s11, %s2025_s13  }
  0x58   : > { %s44_s24 = sadd.s32 1, %s2007_s20  ;;  %s35_s8 = sadd.s32 1, %s2015_s22 }
  0x59   : > { %p51_p2 = scmp.ne.s32.totalorder %s2007_s20, %s2003_s19  ;;  %p37_p8 = scmp.ge.s32.totalorder %s35_s8, 2 }
  0x5a   : > { %p52_p13 = scmp.eq.s32.totalorder %s2019_s23, 0  ;;  %p2450_p6 = scmp.ne.s32.totalorder %s2443_s27, 0 }
  0x5b   : > { %p1690_p3 = scmp.lt.s32.totalorder %s2019_s23, 2  ;;  %s2466_s8 = smov (%p37_p8, %s35_s8), 0 }
  0x5c   : > { %p2223_p10 = por %p2450_p6, %p51_p2  ;;  %p53_p5 = por %p52_p13, %p51_p2 }
  0x5d   : > { %s235_s14 = sand.u32 1, %s2007_s20   ;;  %s39_s15 = ssub.s32 %s2015_s22, %s2466_s8 }
  0x5e   : > { %p42_p7 = scmp.eq.s32.totalorder %s39_s15, 0  ;;  %s1346_s12 = sshll.u32 %s235_s14, 3 }
  0x5f   : > { %s1430_s16 = sshll.u32 %s2015_s22, 7  ;;  %s239_s9 = scalar_lea.vmem [#allocation4], %s1346_s12 }
  0x60   : > { %s2235_s17 = scalar_select %p42_p7, %s2007_s20, %s44_s24  }
  0x61   : > { %s2240_s27 = scalar_lea.hbm %s2429_s0, %s1430_s16  ;;  %s248_s7 = sshll.u32 %s239_s9, 4  ;;  %s2242_s7 = int_to_ptr.vmem [resolvable:$true] %s248_s7 }
  0x62   : > { %p2246_p11 = pnand %p1690_p3, %p53_p5  ;;  %s2250_s18 = scalar_lea.sflag [#allocation5], %s235_s14 }
  0x63   : > { %s1899_s24 = scalar_lea.hbm %s2240_s27, 128  ;;  %s1904_s16 = scalar_lea.hbm %s2429_s0, 256 }
  0x64   : > { %p1900_p9 = scmp.ne.s32.totalorder %s2240_s27, %s1899_s24  ;;  %p1901_p12 = pneg %p2246_p11 }
  0x65   : > { %p1905_p4 = scmp.lt.u32.totalorder %s2240_s27, %s2429_s0  ;;  %p1906_p2 = scmp.lt.u32.totalorder %s1904_s16, %s1899_s24 }
  0x66   : > { %p1902_p0 = pnand %p1901_p12, %p1900_p9  ;;  %p1908_p13 = scmp.lt.u32.totalorder %s1899_s24, %s2240_s27 }
  0x67   : > { %p1907_p8 = por %p1906_p2, %p1905_p4 }
  0x68   : > { %p1903_p1 = pneg %p1902_p0 }
  0x69   : > { %p1909_p6 = por %p1908_p13, %p1907_p8 }
  0x6b   : > { %p1910_p3 = pnand %p1909_p6, %p1903_p1 }
  0x6d   : > { %1913 = shalt.err (!%p1910_p3)
}
  0x6e   : > { %s1914_s14 = scalar_lea.vmem %s2242_s7, 128  ;;  %s2026_s9 = smov [#allocation4]  }
  0x6f   : > { %p1915_p5 = scmp.ne.s32.totalorder %s2242_s7, %s1914_s14  ;;  %s1919_s15 = sshll.u32 %s2026_s9, 4  ;;  %s1920_s15 = int_to_ptr.vmem [resolvable:$false] %s1919_s15 }
  0x70   : > { %s1921_s12 = scalar_lea.vmem %s1920_s15, 256  ;;  %p1922_p0 = scmp.lt.s32.totalorder %s2242_s7, %s1920_s15 }
  0x71   : > { %p1917_p7 = pnand %p1915_p5, %p1901_p12  ;;  %p1923_p4 = scmp.lt.s32.totalorder %s1921_s12, %s1914_s14 }
  0x73   : > { %p1918_p9 = pneg %p1917_p7  ;;  %p1924_p2 = por %p1923_p4, %p1922_p0 }
  0x75   : > { %p1925_p8 = pnand %p1924_p2, %p1918_p9 }
  0x77   : > { %1928 = shalt.err (!%p1925_p8)
}
  0x78   : > { %1682 = dma.hbm_to_vmem [thread:$0]  (!%p2246_p11), %s2240_s27, 128, %s2242_s7, %s2250_s18, %s2024_s11, %s2024_s11, %s2025_s13  }
  0x79   : > { %p2453_p12 = scmp.ne.s32.totalorder %s2447_s30, 0 }
  0x7a   : > { %s2284_s24 = sand.u32 (!%p2453_p12), 1, %s2003_s19   ;;  %p2454_p1 = scmp.ne.s32.totalorder (!%p2453_p12), %s2444_s28, 0 }
  0x7b   : > { %260 = sbr.rel (%p2453_p12) target bundleno = 711 (0x2c7), region = 40  ;;  %s1350_s16 = sshll.u32 (!%p2453_p12), %s2284_s24, 3 }
  0x7c   : > { %s263_s25 = scalar_lea.sflag (!%p2453_p12), [#allocation5], %s2284_s24  ;;  %s2290_s10 = scalar_lea.vmem (!%p2453_p12), [#allocation4], %s1350_s16 }
  0x82   : > { %1982 = dma.done.wait (%p2454_p1), %s263_s25, 128  }
  0x83   : > { %1984 = vsyncadd (%p2454_p1), %s263_s25, 4294967168  ;;  %p2455_p11 = scmp.ne.s32.totalorder %s2442_s26, 0 }
  0x85   : > { %1986 = dma.done.wait (%p2455_p11), [#allocation8], 6144  }
  0x86   : > { %1988 = vsyncadd (%p2455_p11), [#allocation8], 4294961152 }
  0x87   : > { %1990 = dma.done.wait (%p2455_p11), [#allocation11], 1024  }
  0x88   : > { %1992 = vsyncadd (%p2455_p11), [#allocation11], 4294966272  ;;  %v2027_v0 = vmov 0   ;;  %v1753_v1 = vld [vmem:[#allocation7 + $0x40] sm:$0xff]   ;;  %v1755_v3 = vld [vmem:[#allocation7 + $0x48] sm:$0xff]   ;;  %vm360_vm0 = vcmask 1044480  }
  0x89   : > { %312 = vst [vmem:[#allocation2] sm:$0xff] %v2027_v0  ;;  %v1754_v2 = vld [vmem:[#allocation7] sm:$0xff]   ;;  %1513 = vmatprep.subr.bf16.mxu0 %v1753_v1  ;;  %v1756_v4 = vld [vmem:[#allocation7 + $0x8] sm:$0xff]   ;;  %v1757_v5 = vld [vmem:[#allocation7 + $0x50] sm:$0xff]   ;;  %vm464_vm1 = vcmask 1045504   ;;  %vm586_vm2 = vcmask 1043456  }
  0x8a   : > { %1533 = vmatprep.subr.bf16.mxu1 %v1754_v2  ;;  %1514 = vmatpush3.bf16.msra.mxu0 %v1753_v1  ;;  %v1758_v6 = vld [vmem:[#allocation7 + $0x10] sm:$0xff]   ;;  %v1759_v7 = vld [vmem:[#allocation7 + $0x58] sm:$0xff]   ;;  %v1761_v9 = vld [vmem:[#allocation7 + $0x60] sm:$0xff]   ;;  %v2028_v42 = vmov 0.0   ;;  %vm2029_vm3 = vmmov 0   ;;  %s1436_s7 = sshll.u32 %s2011_s21, 7 }
  0x8b   : > { %1534 = vmatpush3.bf16.msra.mxu1 %v1754_v2  ;;  %1515 = vmatprep.subr.bf16.mxu0 %v1755_v3  ;;  %v1760_v8 = vld [vmem:[#allocation7 + $0x18] sm:$0xff]   ;;  %v1762_v10 = vld [vmem:[#allocation7 + $0x20] sm:$0xff]   ;;  %v1763_v11 = vld [vmem:[#allocation7 + $0x68] sm:$0xff]   ;;  %s304_s18 = scalar_lea.vmem [#allocation12], %s1350_s16  ;;  %s2378_s15 = scalar_lea.hbm %s2434_s5, %s1436_s7 }
  0x8c   : > { %1535 = vmatprep.subr.bf16.mxu1 %v1756_v4  ;;  %v2306_v12 = vld [vmem:[%s2290_s10] sm:$0xff]   ;;  %v1764_v13 = vld [vmem:[#allocation7 + $0x28] sm:$0xff]   ;;  %v1770_v26 = vld [vmem:[#allocation7 + $0x80] sm:$0xff]   ;;  %s1223_s6 = sshll.u32 %s304_s18, 4  ;;  %s1208_s12 = scalar_lea.sflag [#allocation6], %s2284_s24  ;;  %s2380_s6 = int_to_ptr.vmem [resolvable:$true] %s1223_s6 }
  0x8d   : > { %v1765_v14 = vld [vmem:[#allocation7 + $0x70] sm:$0xff]   ;;  %321 = vst [vmem:[#allocation2 + $0x8] sm:$0xff] %v2306_v12  ;;  %v1767_v18 = vld [vmem:[#allocation7 + $0x78] sm:$0xff]   ;;  %v588_v29 = vrot.slane %v2306_v12, 4  ;;  %v1771_v32 = vld [vmem:[#allocation7 + $0x88] sm:$0xff]   ;;  %s1929_s25 = scalar_lea.vmem %s2380_s6, 128 }
  0x8e   : > { %1516 = vmatpush3.bf16.msra.mxu0 %v1755_v3  ;;  %v1766_v15 = vld [vmem:[#allocation7 + $0x30] sm:$0xff]   ;;  %v1768_v19 = vld [vmem:[#allocation7 + $0x38] sm:$0xff]   ;;  %v1774_v36 = vld [vmem:[#allocation7 + $0xa0] sm:$0xff]   ;;  %p1930_p13 = scmp.ne.s32.totalorder %s2380_s6, %s1929_s25  ;;  %s2030_s21 = smov [#allocation12]  }
  0x8f   : > { %1536 = vmatpush3.bf16.msra.mxu1 %v1756_v4  ;;  %1517 = vmatprep.subr.bf16.mxu0 %v1757_v5  ;;  %v1772_v34 = vld [vmem:[#allocation7 + $0x90] sm:$0xff]   ;;  %v1773_v35 = vld [vmem:[#allocation7 + $0x98] sm:$0xff]   ;;  %v1775_v37 = vld [vmem:[#allocation7 + $0xa8] sm:$0xff]   ;;  %s1933_s16 = sshll.u32 %s2030_s21, 4  ;;  %s1934_s16 = int_to_ptr.vmem [resolvable:$false] %s1933_s16 }
  0x90   : > { %1537 = vmatprep.subr.bf16.mxu1 %v1758_v6  ;;  %v340_v16 = vld [vmem:[#allocation2] sm:$0xf8]  ;;  %v1778_v40 = vld [vmem:[#allocation9 + $0x40] sm:$0xff]   ;;  %v1780_v43 = vld [vmem:[#allocation9 + $0x48] sm:$0xff]   ;;  %p1931_p6 = pnand %p1930_p13, %p2223_p10  ;;  %s1935_s10 = scalar_lea.vmem %s1934_s16, 256 }
  0x91   : > { %v322_v17 = vld [vmem:[#allocation2] sm:$0xfc]  ;;  %v361_v20 = vrot.slane %v340_v16, 3  ;;  %v1779_v41 = vld [vmem:[#allocation9] sm:$0xff]   ;;  %v1781_v44 = vld [vmem:[#allocation9 + $0x8] sm:$0xff]   ;;  %p1936_p5 = scmp.lt.s32.totalorder %s2380_s6, %s1934_s16  ;;  %p1937_p7 = scmp.lt.s32.totalorder %s1935_s10, %s1929_s25 }
  0x92   : > { %1518 = vmatpush3.bf16.msra.mxu0 %v1757_v5  ;;  %v465_v21 = vrot.slane %v322_v17, 2  ;;  %v566_v27 = vld [vmem:[#allocation2] sm:$0xf0]  ;;  %v1776_v38 = vld [vmem:[#allocation7 + $0xb0] sm:$0xff]   ;;  %v1786_v49 = vld [vmem:[#allocation9 + $0x60] sm:$0xff]   ;;  %p1932_p3 = pneg %p1931_p6 }
  0x93   : > { %1538 = vmatpush3.bf16.msra.mxu1 %v1758_v6  ;;  %1519 = vmatprep.subr.bf16.mxu0 %v1759_v7  ;;  %v587_v28 = vrot.slane %v566_v27, 4  ;;  %1206 = vst [vmem:[#allocation2] sm:$0xff] %v2306_v12  ;;  %v1777_v39 = vld [vmem:[#allocation7 + $0xb8] sm:$0xff]   ;;  %v1782_v45 = vld [vmem:[#allocation9 + $0x50] sm:$0xff]   ;;  %v1787_v50 = vld [vmem:[#allocation9 + $0x20] sm:$0xff]   ;;  %p1938_p9 = por %p1937_p7, %p1936_p5 }
  0x94   : > { %1539 = vmatprep.subr.bf16.mxu1 %v1760_v8  ;;  %v341_v22 = vld [vmem:[#allocation2 + $0x8] sm:$0x7f]  ;;  %v1783_v46 = vld [vmem:[#allocation9 + $0x10] sm:$0xff]   ;;  %v1788_v51 = vld [vmem:[#allocation9 + $0x68] sm:$0xff]  }
  0x95   : > { %v323_v23 = vld [vmem:[#allocation2 + $0x8] sm:$0x3f]  ;;  %v362_v24 = vrot.slane %v341_v22, 3  ;;  %v589_v33 = vsel %vm586_vm2, %v587_v28, %v588_v29  ;;  %v1789_v52 = vld [vmem:[#allocation9 + $0x28] sm:$0xff]   ;;  %v1790_v53 = vld [vmem:[#allocation9 + $0x70] sm:$0xff]   ;;  %p1939_p0 = pnand %p1938_p9, %p1932_p3 }
  0x96   : > { %1520 = vmatpush3.bf16.msra.mxu0 %v1759_v7  ;;  %v466_v25 = vrot.slane %v323_v23, 2  ;;  %v1784_v47 = vld [vmem:[#allocation9 + $0x58] sm:$0xff]   ;;  %v1791_v54 = vld [vmem:[#allocation9 + $0x30] sm:$0xff]  }
  0x97   : > { %1540 = vmatpush3.bf16.msra.mxu1 %v1760_v8  ;;  %1521 = vmatprep.subr.bf16.mxu0 %v1761_v9  ;;  %v363_v30 = vsel %vm360_vm0, %v361_v20, %v362_v24  ;;  %v1785_v48 = vld [vmem:[#allocation9 + $0x18] sm:$0xff]   ;;  %v1380_v6 = vld [vmem:[%s2433_s4] ss:$0 sm:$0xff] }
  0x98   : > { %1541 = vmatprep.subr.bf16.mxu1 %v1762_v10  ;;  %v467_v31 = vsel %vm464_vm1, %v465_v21, %v466_v25  ;;  %1529 = vmatprep.mubr.bf16.mxu0 %v363_v30  ;;  %v1792_v55 = vld [vmem:[#allocation9 + $0x78] sm:$0xff]  }
  0x99   : > { %1549 = vmatprep.mubr.bf16.mxu1 %v467_v31  ;;  %v1793_v56 = vld [vmem:[#allocation9 + $0x38] sm:$0xff]  }
  0x9a   : > { %1522 = vmatpush3.bf16.msra.mxu0 %v1761_v9 }
  0x9b   : > { %1542 = vmatpush3.bf16.msra.mxu1 %v1762_v10  ;;  %1523 = vmatprep.subr.bf16.mxu0 %v1763_v11 }
  0x9c   : > { %1543 = vmatprep.subr.bf16.mxu1 %v1764_v13 }
  0x9e   : > { %1524 = vmatpush3.bf16.msra.mxu0 %v1763_v11 }
  0x9f   : > { %1544 = vmatpush3.bf16.msra.mxu1 %v1764_v13  ;;  %1525 = vmatprep.subr.bf16.mxu0 %v1765_v14 }
  0xa0   : > { %1545 = vmatprep.subr.bf16.mxu1 %v1766_v15 }
  0xa2   : > { %1526 = vmatpush3.bf16.msra.mxu0 %v1765_v14 }
  0xa3   : > { %1546 = vmatpush3.bf16.msra.mxu1 %v1766_v15  ;;  %1527 = vmatprep.subr.bf16.mxu0 %v1767_v18 }
  0xa4   : > { %1547 = vmatprep.subr.bf16.mxu1 %v1768_v19 }
  0xa6   : > { %1528 = vmatpush3.bf16.msra.mxu0 %v1767_v18 }
  0xa7   : > { %1548 = vmatpush3.bf16.msra.mxu1 %v1768_v19  ;;  %1553 = vmatprep.subr.bf16.mxu0 %v1770_v26 }
  0xa8   : > { %1573 = vmatprep.subr.bf16.mxu1 %v2028_v42 }
  0xa9   : > { %1530 = vmatmul.mubr.bf16.vlgmr.msra.gmra.mrb[0].mxu0 %v362_v24 }
  0xaa   : > { %1550 = vmatmul.mubr.bf16.vlgmr.msra.gmra.mrb[0].mxu1 %v466_v25  ;;  %1554 = vmatpush3.bf16.msra.mxu0 %v1770_v26 }
  0xab   : > { %1555 = vmatprep.subr.bf16.mxu0 %v1771_v32  ;;  %1569 = vmatprep.mubr.bf16.mxu0 %v589_v33  ;;  %v1798_v33 = vld [vmem:[#allocation9 + $0x80] sm:$0xff]  }
  0xac   : > { %1574 = vmatpush3.bf16.msra.mxu1 %v1778_v40  ;;  %1589 = vmatprep.mubr.msk.bf16.mxu1 %vm2029_vm3, %v2028_v42  ;;  %v1804_v40 = vld [vmem:[#allocation9 + $0x98] sm:$0xff]  }
  0xad   : > { %1575 = vmatprep.subr.bf16.mxu1 %v2028_v42 }
  0xae   : > { %1556 = vmatpush3.bf16.msra.mxu0 %v1771_v32 }
  0xaf   : > { %1557 = vmatprep.subr.bf16.mxu0 %v1772_v34 }
  0xb0   : > { %1576 = vmatpush3.bf16.msra.mxu1 %v1780_v43  ;;  %v1806_v43 = vld [vmem:[#allocation9 + $0xa0] sm:$0xff]  }
  0xb1   : > { %1577 = vmatprep.subr.bf16.mxu1 %v2028_v42 }
  0xb2   : > { %1558 = vmatpush3.bf16.msra.mxu0 %v1772_v34  ;;  %v1799_v34 = vld [vmem:[#allocation10] sm:$0xff]  }
  0xb3   : > { %1559 = vmatprep.subr.bf16.mxu0 %v1773_v35 }
  0xb4   : > { %1578 = vmatpush3.bf16.msra.mxu1 %v1782_v45  ;;  %v1808_v45 = vld [vmem:[#allocation9 + $0xa8] sm:$0xff]  }
  0xb5   : > { %1579 = vmatprep.subr.bf16.mxu1 %v2028_v42 }
  0xb6   : > { %1560 = vmatpush3.bf16.msra.mxu0 %v1773_v35 }
  0xb7   : > { %1561 = vmatprep.subr.bf16.mxu0 %v1774_v36 }
  0xb8   : > { %1580 = vmatpush3.bf16.msra.mxu1 %v1784_v47  ;;  %v1810_v47 = vld [vmem:[#allocation9 + $0xb0] sm:$0xff]  }
  0xb9   : > { %1581 = vmatprep.subr.bf16.mxu1 %v2028_v42 }
  0xba   : > { %1562 = vmatpush3.bf16.msra.mxu0 %v1774_v36  ;;  %v1800_v36 = vld [vmem:[#allocation9 + $0x88] sm:$0xff]  }
  0xbb   : > { %1563 = vmatprep.subr.bf16.mxu0 %v1775_v37 }
  0xbc   : > { %1582 = vmatpush3.bf16.msra.mxu1 %v1786_v49  ;;  %v1812_v49 = vld [vmem:[#allocation9 + $0xb8] sm:$0xff]  }
  0xbd   : > { %1583 = vmatprep.subr.bf16.mxu1 %v2028_v42 }
  0xbe   : > { %1564 = vmatpush3.bf16.msra.mxu0 %v1775_v37  ;;  %v1801_v37 = vld [vmem:[#allocation10 + $0x8] sm:$0xff]  }
  0xbf   : > { %1565 = vmatprep.subr.bf16.mxu0 %v1776_v38 }
  0xc0   : > { %1584 = vmatpush3.bf16.msra.mxu1 %v1788_v51 }
  0xc1   : > { %1585 = vmatprep.subr.bf16.mxu1 %v2028_v42 }
  0xc2   : > { %1566 = vmatpush3.bf16.msra.mxu0 %v1776_v38  ;;  %v1802_v38 = vld [vmem:[#allocation9 + $0x90] sm:$0xff]  }
  0xc3   : > { %1567 = vmatprep.subr.bf16.mxu0 %v1777_v39 }
  0xc4   : > { %1586 = vmatpush3.bf16.msra.mxu1 %v1790_v53 }
  0xc5   : > { %1587 = vmatprep.subr.bf16.mxu1 %v2028_v42 }
  0xc6   : > { %1568 = vmatpush3.bf16.msra.mxu0 %v1777_v39  ;;  %v1803_v39 = vld [vmem:[#allocation10 + $0x10] sm:$0xff]  }
  0xc7   : > { %1593 = vmatprep.subr.bf16.mxu0 %v2028_v42 }
  0xc8   : > { %1588 = vmatpush3.bf16.msra.mxu1 %v1792_v55 }
  0xc9   : > { %1570 = vmatmul.mubr.bf16.vlgmr.msra.gmra.mrb[4].mxu0 %v588_v29  ;;  %1613 = vmatprep.subr.bf16.mxu1 %v2028_v42 }
  0xca   : > { %1594 = vmatpush3.bf16.msra.mxu0 %v1779_v41  ;;  %1609 = vmatprep.mubr.msk.bf16.mxu0 %vm2029_vm3, %v2028_v42  ;;  %v1805_v41 = vld [vmem:[#allocation10 + $0x18] sm:$0xff]  }
  0xcb   : > { %1595 = vmatprep.subr.bf16.mxu0 %v2028_v42 }
  0xce   : > { %1596 = vmatpush3.bf16.msra.mxu0 %v1781_v44  ;;  %v1807_v44 = vld [vmem:[#allocation10 + $0x20] sm:$0xff]  }
  0xcf   : > { %1597 = vmatprep.subr.bf16.mxu0 %v2028_v42 }
  0xd2   : > { %1598 = vmatpush3.bf16.msra.mxu0 %v1783_v46  ;;  %v1809_v46 = vld [vmem:[#allocation10 + $0x28] sm:$0xff]  }
  0xd3   : > { %1599 = vmatprep.subr.bf16.mxu0 %v2028_v42 }
  0xd6   : > { %1600 = vmatpush3.bf16.msra.mxu0 %v1785_v48  ;;  %v1811_v48 = vld [vmem:[#allocation10 + $0x30] sm:$0xff]  }
  0xd7   : > { %1601 = vmatprep.subr.bf16.mxu0 %v2028_v42 }
  0xda   : > { %1602 = vmatpush3.bf16.msra.mxu0 %v1787_v50  ;;  %v1813_v50 = vld [vmem:[#allocation10 + $0x38] sm:$0xff]  }
  0xdb   : > { %1603 = vmatprep.subr.bf16.mxu0 %v2028_v42 }
  0xde   : > { %1604 = vmatpush3.bf16.msra.mxu0 %v1789_v52 }
  0xdf   : > { %1605 = vmatprep.subr.bf16.mxu0 %v2028_v42 }
  0xe2   : > { %1606 = vmatpush3.bf16.msra.mxu0 %v1791_v54 }
  0xe3   : > { %1607 = vmatprep.subr.bf16.mxu0 %v2028_v42 }
  0xe6   : > { %1608 = vmatpush3.bf16.msra.mxu0 %v1793_v56 }
  0xe7   : > { %1633 = vmatprep.subr.bf16.mxu0 %v2028_v42 }
 0x17c   : > { %v1531_v57 = vpop.f32.mrb[0].mxu0 }
 0x17d   : > { %v1551_v58 = vpop.f32.mrb[0].mxu1  ;;  %v448_v59 = vpop.f32.mrb[1].mxu0 }
 0x17e   : > { %v561_v60 = vadd.f32 %v1551_v58, %v1531_v57  ;;  %v552_v61 = vpop.f32.mrb[1].mxu1  ;;  %v1532_v62 = vpop.f32.mrb[2].mxu0 }
 0x17f   : > { %v553_v63 = vadd.f32 %v552_v61, %v448_v59  ;;  %v1552_v1 = vpop.f32.mrb[2].mxu1  ;;  %v451_v2 = vpop.f32.mrb[3].mxu0 }
 0x180   : > { %v555_v3 = vpop.f32.mrb[3].mxu1  ;;  %v1414_v1 = vld [vmem:[%s2433_s4 + $0x2] ss:$0 sm:$0xff] }
 0x181   : > { %v556_v4 = vadd.f32 %v555_v3, %v451_v2 }
 0x19c   : > { %v1571_v5 = vpop.f32.mrb[4].mxu0 }
 0x19d   : > { %v690_v7 = vadd.f32 %v1571_v5, %v561_v60  ;;  %v674_v8 = vpop.f32.mrb[5].mxu0 }
 0x19e   : > { %v688_v9 = vadd.f32 %v674_v8, %v553_v63  ;;  %v1572_v10 = vpop.f32.mrb[6].mxu0 }
 0x19f   : > { %v698_v11 = vadd.f32 %v1380_v6, %v690_v7  ;;  %v677_v13 = vpop.f32.mrb[7].mxu0 }
 0x1a0   : > { %v696_v14 = vadd.f32 %v1380_v6, %v688_v9  ;;  %v689_v15 = vadd.f32 %v677_v13, %v556_v4 }
 0x1a1   : > { %v701_v16 = vmax.f32 %v698_v11, 0.0 }
 0x1a2   : > { %v697_v17 = vadd.f32 %v1380_v6, %v689_v15  ;;  %v699_v19 = vmax.f32 %v696_v14, 0.0 }
 0x1a3   : > { %v1433_v18 = vpack.c.bf16 %v701_v16, %v701_v16 }
 0x1a4   : > { %v700_v20 = vmax.f32 %v697_v17, 0.0 }
 0x1a5   : > { %717 = vst [vmem:[#allocation3 + $0x8] sm:$0xf] %v1433_v18 }
 0x1a6   : > { %v1440_v21 = vpack.c.bf16 %v700_v20, %v699_v19 }
 0x1a8   : > { %1441 = vst [vmem:[#allocation3] sm:$0xff] %v1440_v21  }
 0x1a9   : > { %721 = vst [vmem:[#allocation3] sm:$0xf] %v2027_v0 }
 0x1ac   : > { %v1795_v22 = vld [vmem:[#allocation3 + $0x8] ss:$0 sps:$4 sm:$0x77]  }
 0x1ad   : > { %v1797_v24 = vld [vmem:[#allocation3 + $0x8] ss:$0 sps:$4 sm:$0x33]   ;;  %v768_v30 = vrot.slane %v1795_v22, 3 }
 0x1ae   : > { %v867_v32 = vrot.slane %v1797_v24, 2  ;;  %v959_v51 = vld [vmem:[#allocation3 + $0x8] sm:$0xf] }
 0x1af   : > { %v2340_v23 = vld [vmem:[#allocation3 + $0x4] sm:$0xf] }
 0x1b0   : > { %v741_v25 = vld [vmem:[#allocation3] sm:$0x8]  ;;  %v1404_v52 = vcombine.low %v2340_v23, %v959_v51 }
 0x1b1   : > { %v722_v26 = vld [vmem:[#allocation3] sm:$0xc]  ;;  %v1384_v27 = vcombine.low %v741_v25, %v2340_v23 }
 0x1b2   : > { %v1394_v28 = vcombine.low %v722_v26, %v2340_v23 }
 0x1b3   : > { %v767_v29 = vrot.slane %v1384_v27, 3 }
 0x1b4   : > { %v866_v31 = vrot.slane %v1394_v28, 2 }
 0x1b5   : > { %v769_v35 = vsel %vm360_vm0, %v767_v29, %v768_v30 }
 0x1b6   : > { %v868_v0 = vsel %vm464_vm1, %v866_v31, %v867_v32  ;;  %1590 = vmatmul.mubr.bf16.vlgmr.msra.gmra.mrb[4].mxu1 %v769_v35 }
 0x1b7   : > { %1610 = vmatmul.mubr.bf16.vlgmr.msra.gmra.mrb[8].mxu0 %v868_v0  ;;  %1614 = vmatpush3.bf16.msra.mxu1 %v1798_v33 }
 0x1b8   : > { %1634 = vmatpush3.bf16.msra.mxu0 %v1799_v34  ;;  %1615 = vmatprep.subr.bf16.mxu1 %v2028_v42 }
 0x1b9   : > { %1635 = vmatprep.subr.bf16.mxu0 %v2028_v42  ;;  %1629 = vmatprep.mubr.msk.bf16.mxu1 %vm2029_vm3, %v2028_v42 }
 0x1ba   : > { %1649 = vmatprep.mubr.msk.bf16.mxu0 %vm2029_vm3, %v2028_v42 }
 0x1bb   : > { %1616 = vmatpush3.bf16.msra.mxu1 %v1800_v36 }
 0x1bc   : > { %1636 = vmatpush3.bf16.msra.mxu0 %v1801_v37  ;;  %1617 = vmatprep.subr.bf16.mxu1 %v2028_v42 }
 0x1bd   : > { %1637 = vmatprep.subr.bf16.mxu0 %v2028_v42 }
 0x1bf   : > { %1618 = vmatpush3.bf16.msra.mxu1 %v1802_v38 }
 0x1c0   : > { %1638 = vmatpush3.bf16.msra.mxu0 %v1803_v39  ;;  %1619 = vmatprep.subr.bf16.mxu1 %v2028_v42 }
 0x1c1   : > { %1639 = vmatprep.subr.bf16.mxu0 %v2028_v42 }
 0x1c3   : > { %1620 = vmatpush3.bf16.msra.mxu1 %v1804_v40 }
 0x1c4   : > { %1640 = vmatpush3.bf16.msra.mxu0 %v1805_v41  ;;  %1621 = vmatprep.subr.bf16.mxu1 %v2028_v42 }
 0x1c5   : > { %1641 = vmatprep.subr.bf16.mxu0 %v2028_v42 }
 0x1c7   : > { %1622 = vmatpush3.bf16.msra.mxu1 %v1806_v43 }
 0x1c8   : > { %1642 = vmatpush3.bf16.msra.mxu0 %v1807_v44  ;;  %1623 = vmatprep.subr.bf16.mxu1 %v2028_v42 }
 0x1c9   : > { %1643 = vmatprep.subr.bf16.mxu0 %v2028_v42 }
 0x1cb   : > { %1624 = vmatpush3.bf16.msra.mxu1 %v1808_v45 }
 0x1cc   : > { %1644 = vmatpush3.bf16.msra.mxu0 %v1809_v46  ;;  %1625 = vmatprep.subr.bf16.mxu1 %v2028_v42 }
 0x1cd   : > { %1645 = vmatprep.subr.bf16.mxu0 %v2028_v42 }
 0x1cf   : > { %1626 = vmatpush3.bf16.msra.mxu1 %v1810_v47 }
 0x1d0   : > { %1646 = vmatpush3.bf16.msra.mxu0 %v1811_v48  ;;  %1627 = vmatprep.subr.bf16.mxu1 %v2028_v42 }
 0x1d1   : > { %1647 = vmatprep.subr.bf16.mxu0 %v2028_v42  ;;  %v1413_v42 = vld [vmem:[%s2433_s4 + $0x1] ss:$0 sm:$0xff] }
 0x1d3   : > { %1628 = vmatpush3.bf16.msra.mxu1 %v1812_v49 }
 0x1d4   : > { %1648 = vmatpush3.bf16.msra.mxu0 %v1813_v50 }
 0x1d6   : > { %1630 = vmatmul.mubr.bf16.vlgmr.msra.gmra.mrb[8].mxu1 %v1404_v52 }
 0x1d7   : > { %1650 = vmatmul.mubr.bf16.vlgmr.msra.gmra.mrb[12].mxu0 %v2306_v12 }
 0x289   : > { %v853_v53 = vpop.f32.mrb[4].mxu1 }
 0x28a   : > { %v952_v54 = vpop.f32.mrb[8].mxu0  ;;  %v1591_v56 = vpop.f32.mrb[5].mxu1 }
 0x28b   : > { %v953_v55 = vadd.f32 %v952_v54, %v853_v53  ;;  %v1611_v57 = vpop.f32.mrb[9].mxu0  ;;  %v856_v58 = vpop.f32.mrb[6].mxu1 }
 0x28c   : > { %v955_v59 = vpop.f32.mrb[10].mxu0  ;;  %v1592_v61 = vpop.f32.mrb[7].mxu1 }
 0x28d   : > { %v956_v60 = vadd.f32 %v955_v59, %v856_v58  ;;  %v1612_v62 = vpop.f32.mrb[11].mxu0 }
 0x2a9   : > { %v1062_v63 = vpop.f32.mrb[8].mxu1 }
 0x2aa   : > { %v1184_v12 = vpop.f32.mrb[12].mxu0  ;;  %v1069_v2 = vadd.f32 %v1062_v63, %v953_v55  ;;  %v1631_v3 = vpop.f32.mrb[9].mxu1 }
 0x2ab   : > { %v1651_v4 = vpop.f32.mrb[13].mxu0  ;;  %v1065_v5 = vpop.f32.mrb[10].mxu1  ;;  %v1185_v8 = vadd.f32 %v1414_v1, %v1184_v12 }
 0x2ac   : > { %v1187_v6 = vpop.f32.mrb[14].mxu0  ;;  %v1076_v7 = vadd.f32 %v1413_v42, %v1069_v2  ;;  %v1070_v9 = vadd.f32 %v1065_v5, %v956_v60  ;;  %v1632_v10 = vpop.f32.mrb[11].mxu1 }
 0x2ad   : > { %v1652_v11 = vpop.f32.mrb[15].mxu0  ;;  %v1188_v17 = vadd.f32 %v1414_v1, %v1187_v6 }
 0x2ae   : > { %v1078_v13 = vmax.f32 %v1076_v7, 0.0  ;;  %v1077_v14 = vadd.f32 %v1413_v42, %v1070_v9 }
 0x2b0   : > { %v1191_v15 = vadd.f32 %v1185_v8, %v1078_v13  ;;  %v1079_v16 = vmax.f32 %v1077_v14, 0.0 }
 0x2b2   : > { %v1192_v18 = vadd.f32 %v1188_v17, %v1079_v16  ;;  %v1193_v19 = vmax.f32 %v1191_v15, 0.0 }
 0x2b4   : > { %v1194_v20 = vmax.f32 %v1192_v18, 0.0 }
 0x2b6   : > { %v1445_v21 = vpack.c.bf16 %v1194_v20, %v1193_v19 }
 0x2b8   : > { %1446 = vst [vmem:[%s304_s18] sm:$0xff] %v1445_v21  }
 0x2b9   : > { %1942 = shalt.err (!%p1939_p0)
}
 0x2ba   : > { %s1943_s26 = scalar_lea.hbm %s2378_s15, 128  ;;  %s1947_s11 = scalar_lea.hbm %s2434_s5, 256 }
 0x2bb   : > { %p1944_p4 = scmp.ne.s32.totalorder %s2378_s15, %s1943_s26  ;;  %p1948_p12 = scmp.lt.u32.totalorder %s2378_s15, %s2434_s5 }
 0x2bc   : > { %p1949_p1 = scmp.lt.u32.totalorder %s1947_s11, %s1943_s26  ;;  %p1951_p13 = scmp.lt.u32.totalorder %s1943_s26, %s2378_s15 }
 0x2bd   : > { %p1945_p2 = pnand %p1944_p4, %p2223_p10 }
 0x2be   : > { %p1950_p11 = por %p1949_p1, %p1948_p12 }
 0x2bf   : > { %p1946_p8 = pneg %p1945_p2 }
 0x2c0   : > { %p1952_p6 = por %p1951_p13, %p1950_p11 }
 0x2c2   : > { %p1953_p3 = pnand %p1952_p6, %p1946_p8 }
 0x2c4   : > { %1956 = shalt.err (!%p1953_p3)
}
 0x2c5   : > { %s2031_s7 = smov 64   ;;  %s2032_s18 = smov 4  }
 0x2c6   : > { %1667 = dma.vmem_to_hbm [thread:$0]  (%p2223_p10), %s2380_s6, 128, %s2378_s15, %s1208_s12, %s2031_s7, %s2031_s7, %s2032_s18  }
 0x2c7 PF: > { %s2456_s14 = sld [smem:[#allocation17_spill]]  ;;  %s2457_s9 = sld [smem:[#allocation18_spill]] }
 0x2c8   : > { %p2459_p7 = scmp.ge.s32.totalorder %s2019_s23, 2 }
 0x2cd   : > { %s1238_s25 = sand.u32 1, %s2456_s14   ;;  %p2458_p5 = scmp.ne.s32.totalorder %s2457_s9, 0 }
 0x2ce   : > { %s1239_s21 = scalar_lea.sflag [#allocation6], %s1238_s25 }
 0x2cf   : > { %p1684_p9 = pnand %p2459_p7, %p2458_p5 }
 0x2d1   : > { %1994 = dma.done.wait (!%p1684_p9), %s1239_s21, 128  }
 0x2d2   : > { %1996 = vsyncadd (!%p1684_p9), %s1239_s21, 4294967168  ;;  %s23_s23 = sadd.s32 1, %s2019_s23   ;;  %s2460_s18 = smov %s2003_s19 }
 0x2d3   : > { %p20_p0 = scmp.ge.s32.totalorder %s23_s23, 4   ;;  %s2461_s19 = smov %s2007_s20 }
 0x2d4   : > { %s2462_s20 = smov %s2235_s17  ;;  %s2463_s21 = smov %s2015_s22 }
 0x2d5   : > { %s2464_s22 = smov %s2466_s8  ;;  %22 = sbr.rel (!%p20_p0) target bundleno = 8 (0x8), region = 105 }
 0x2dc   :  { %1244 = vsyncpa [#allocation5], 1 }
 0x2dd   :  { %1246 = vsyncpa [#allocation5 + $0x1], 1 }
 0x2de   :  { %1247 = vsyncpa [#allocation8], 1 }
 0x2df   :  { %1248 = vsyncpa [#allocation11], 1 }
 0x2e0   :  { %1249 = vsyncpa [#allocation6], 1 }
 0x2e1   :  { %1251 = vsyncpa [#allocation6 + $0x1], 1 }

</bundles_post_ra>
